<compile_context>
chip_gen: v5e
topology: v5e:2x2
jax: 0.10.0
libtpu: 0.0.40
codegen_flags: <defaults>
</compile_context>

<pallas_src>
import jax
import jax.numpy as jnp
from jax.experimental import pallas as pl
from jax.experimental.pallas import tpu as pltpu


def _parallel_adapter_kernel(x_ref, w_orig_ref, w1_ref, w2s_ref, o_ref):
    # x_ref     : (C_in,  TL)   spatial on the lane axis (dense 128-lane tiles)
    # w_orig_ref: (C_out, C_in) original 1x1 conv weight
    # w1_ref    : (width, C_in) adapter conv1 weight
    # w2s_ref   : (C_out, width) adapter conv2 weight with `se` pre-folded in
    # o_ref     : (C_out, TL)
    x = x_ref[...]
    # NOTE: K=4 contractions use ~3% of the MXU; that's fine — this kernel is HBM-bound,
    # so the matmuls are not the thing to optimize.
    h = jnp.dot(w1_ref[...], x, preferred_element_type=jnp.float32)
    h = jnp.maximum(h, 0.0).astype(x.dtype)            # ReLU in f32, cast for 2nd matmul
    adapter = jnp.dot(w2s_ref[...], h, preferred_element_type=jnp.float32)
    orig = jnp.dot(w_orig_ref[...], x, preferred_element_type=jnp.float32)
    o_ref[...] = (orig + adapter).astype(o_ref.dtype)


def _pick_tile(length, max_tl=2048):
    """Largest lane tile that is a multiple of 128, divides `length`, and is <= max_tl."""
    if length < 128 or length % 128 != 0:
        return length                      # full-extent block (always legal)
    tl = 128
    while tl * 2 <= max_tl and length % (tl * 2) == 0:
        tl *= 2
    return tl


def parallel_adapter_pallas(x, w_orig, w1, w2, se, *, padding=1, stride=1):
    """ParallelAdapter forward: conv1x1(x) + (conv1x1(relu(conv1x1(x))) * se).

    x     : (N, C_in, H, W)          NCHW, like the PyTorch module
    w_orig: (C_out, C_in, 1, 1)      wrapped original conv weight
    w1    : (width, C_in, 1, 1)      adapter conv1 weight
    w2    : (C_out, width, 1, 1)     adapter conv2 weight
    se    : (1, C_out, 1, 1)         per-channel scale
    Returns (N, C_out, Ho, Wo) with Ho = (H + 2*padding - 1)//stride + 1.
    NOTE: stride/padding handling is only valid for 1x1 kernels.
    """
    N, C_in, H, W = x.shape
    C_out = w_orig.shape[0]
    width = w1.shape[0]
    dtype = x.dtype

    w_orig_m = w_orig.reshape(C_out, C_in).astype(dtype)
    w1_m = w1.reshape(width, C_in).astype(dtype)
    # Fold se into conv2's weight (removes one input + one VPU multiply per element).
    w2s_m = (w2.reshape(C_out, width) * se.reshape(C_out, 1)).astype(dtype)

    skip_border = (stride == 1)
    if skip_border:
        # Bias-free 1x1 conv of zero padding is zero: compute interior only.
        Ho, Wo = H + 2 * padding, W + 2 * padding
        x_flat = x.reshape(N, C_in, H * W)              # free reshape (NCHW contiguous)
    else:
        # General fallback: pad + stride-subsample the input (1x1 kernel only).
        xp = jnp.pad(x, ((0, 0), (0, 0), (padding, padding), (padding, padding)))
        xp = xp[:, :, ::stride, ::stride]
        _, _, Ho, Wo = xp.shape
        x_flat = xp.reshape(N, C_in, Ho * Wo)

    L = x_flat.shape[-1]
    TL = _pick_tile(L)
    grid = (N, L // TL)

    out_flat = pl.pallas_call(
        _parallel_adapter_kernel,
        out_shape=jax.ShapeDtypeStruct((N, C_out, L), dtype),
        grid_spec=pltpu.PrefetchScalarGridSpec(
            num_scalar_prefetch=0,
            grid=grid,
            in_specs=[
                pl.BlockSpec((None, C_in, TL), lambda n, m: (n, 0, m)),   # activations
                pl.BlockSpec((C_out, C_in), lambda n, m: (0, 0)),         # resident weights
                pl.BlockSpec((width, C_in), lambda n, m: (0, 0)),
                pl.BlockSpec((C_out, width), lambda n, m: (0, 0)),
            ],
            out_specs=pl.BlockSpec((None, C_out, TL), lambda n, m: (n, 0, m)),
        ),
        compiler_params=pltpu.CompilerParams(
            dimension_semantics=("parallel", "parallel")),
    )(x_flat, w_orig_m, w1_m, w2s_m)

    if skip_border:
        out = out_flat.reshape(N, C_out, H, W)
        out = jnp.pad(out, ((0, 0), (0, 0), (padding, padding), (padding, padding)))
    else:
        out = out_flat.reshape(N, C_out, Ho, Wo)
    return out


def _reference(x, w_orig, w1, w2, se, padding=1, stride=1):
    """Pure-JAX reference of ParallelAdapter(Conv2d 1x1, ConvAdapter) forward."""
    C_out, width = w_orig.shape[0], w1.shape[0]
    xp = jnp.pad(x, ((0, 0), (0, 0), (padding, padding), (padding, padding)))
    xs = xp[:, :, ::stride, ::stride]
    xs = xs.astype(jnp.float32)
    orig = jnp.einsum("nchw,oc->nohw", xs, w_orig.reshape(C_out, -1).astype(jnp.float32))
    h = jnp.maximum(
        jnp.einsum("nchw,oc->nohw", xs, w1.reshape(width, -1).astype(jnp.float32)), 0.0)
    adapt = jnp.einsum("nchw,oc->nohw", h, w2.reshape(C_out, -1).astype(jnp.float32))
    adapt = adapt * se.reshape(1, C_out, 1, 1).astype(jnp.float32)
    return (orig + adapt).astype(jnp.float32)


if __name__ == "__main__":
    # ParallelAdapter(nn.Conv2d(4, 8, 1, padding=1, bias=False), ConvAdapter, 4, 8, peft_ratio=2)
    inplanes, outplanes, peft_ratio = 4, 8, 2
    width = int(max(inplanes, outplanes) // peft_ratio)           # 4
    N, H, W = 2, 16, 16

    key = jax.random.PRNGKey(0)
    kx, k0, k1, k2, k3 = jax.random.split(key, 5)
    x = jax.random.normal(kx, (N, inplanes, H, W), dtype=jnp.float32)
    w_orig = jax.random.normal(k0, (outplanes, inplanes, 1, 1), dtype=jnp.float32) * 0.1
    w1 = jax.random.normal(k1, (width, inplanes, 1, 1), dtype=jnp.float32) * 0.1
    w2 = jax.random.normal(k2, (outplanes, width, 1, 1), dtype=jnp.float32) * 0.1
    # PyTorch initializes se to zeros; use a NONZERO se here so the adapter path is
    # actually exercised by the correctness check (per review feedback).
    se = jax.random.normal(k3, (1, outplanes, 1, 1), dtype=jnp.float32)

    ref = _reference(x, w_orig, w1, w2, se, padding=1, stride=1)

    # f32 path
    out = parallel_adapter_pallas(x, w_orig, w1, w2, se, padding=1, stride=1)
    out = jax.block_until_ready(out)
    assert out.shape == (N, outplanes, H + 2, W + 2), out.shape
    assert jnp.allclose(out.astype(jnp.float32), ref, atol=1e-4, rtol=1e-4), "f32 mismatch"

    # bf16 storage path (v6e/v7x: halves HBM bytes on a mem-bound kernel; accum stays f32)
    bf = jnp.bfloat16
    out_bf16 = parallel_adapter_pallas(
        x.astype(bf), w_orig.astype(bf), w1.astype(bf), w2.astype(bf), se.astype(bf),
        padding=1, stride=1)
    out_bf16 = jax.block_until_ready(out_bf16)
    assert jnp.allclose(out_bf16.astype(jnp.float32), ref, atol=5e-2, rtol=5e-2), \
        "bf16 mismatch"

    print("KERNEL_OK")
</pallas_src>

<mosaic_0001>
module attributes {stable_mosaic.version = 11 : i64} {
  func.func @_parallel_adapter_kernel(%arg0: i32, %arg1: i32, %arg2: memref<1x4x256xf32, #tpu.memory_space<vmem>>, %arg3: memref<8x4xf32, #tpu.memory_space<vmem>>, %arg4: memref<4x4xf32, #tpu.memory_space<vmem>>, %arg5: memref<8x4xf32, #tpu.memory_space<vmem>>, %arg6: memref<1x8x256xf32, #tpu.memory_space<vmem>>) attributes {dimension_semantics = [#tpu.dimension_semantics<parallel>, #tpu.dimension_semantics<parallel>], iteration_bounds = array<i64: 2, 1>, scalar_prefetch = 0 : i64, scratch_operands = 0 : i64, tpu.core_type = #tpu.core_type<tc>, window_params = [{transform_indices = @transform_0, window_bounds = array<i64: 1, 4, 256>}, {pipeline_mode = #tpu.pipeline_mode<synchronous>, transform_indices = @transform_1, window_bounds = array<i64: 8, 4>}, {pipeline_mode = #tpu.pipeline_mode<synchronous>, transform_indices = @transform_2, window_bounds = array<i64: 4, 4>}, {pipeline_mode = #tpu.pipeline_mode<synchronous>, transform_indices = @transform_3, window_bounds = array<i64: 8, 4>}, {transform_indices = @transform_4, window_bounds = array<i64: 1, 8, 256>}]} {
    %c0 = arith.constant 0 : index
    %c0_0 = arith.constant 0 : index
    %c0_1 = arith.constant 0 : index
    %0 = vector.load %arg2[%c0, %c0_0, %c0_1] : memref<1x4x256xf32, #tpu.memory_space<vmem>>, vector<1x4x256xf32>
    %1 = vector.shape_cast %0 : vector<1x4x256xf32> to vector<4x256xf32>
    %c0_2 = arith.constant 0 : index
    %c0_3 = arith.constant 0 : index
    %2 = vector.load %arg4[%c0_2, %c0_3] : memref<4x4xf32, #tpu.memory_space<vmem>>, vector<4x4xf32>
    %cst = arith.constant dense<0.000000e+00> : vector<4x256xf32>
    %3 = tpu.matmul %2, %1, %cst {dimension_numbers = #tpu.dot_dimension_numbers<[1], [0], [0], [1], [0, 0, 1, 1], [], []>} : vector<4x4xf32>, vector<4x256xf32>, vector<4x256xf32> -> vector<4x256xf32>
    %cst_4 = arith.constant 0.000000e+00 : f32
    %4 = vector.broadcast %cst_4 : f32 to vector<4x256xf32>
    %5 = arith.maximumf %3, %4 : vector<4x256xf32>
    %c0_5 = arith.constant 0 : index
    %c0_6 = arith.constant 0 : index
    %6 = vector.load %arg5[%c0_5, %c0_6] : memref<8x4xf32, #tpu.memory_space<vmem>>, vector<8x4xf32>
    %cst_7 = arith.constant dense<0.000000e+00> : vector<8x256xf32>
    %7 = tpu.matmul %6, %5, %cst_7 {dimension_numbers = #tpu.dot_dimension_numbers<[1], [0], [0], [1], [0, 0, 1, 1], [], []>} : vector<8x4xf32>, vector<4x256xf32>, vector<8x256xf32> -> vector<8x256xf32>
    %c0_8 = arith.constant 0 : index
    %c0_9 = arith.constant 0 : index
    %8 = vector.load %arg3[%c0_8, %c0_9] : memref<8x4xf32, #tpu.memory_space<vmem>>, vector<8x4xf32>
    %cst_10 = arith.constant dense<0.000000e+00> : vector<8x256xf32>
    %9 = tpu.matmul %8, %1, %cst_10 {dimension_numbers = #tpu.dot_dimension_numbers<[1], [0], [0], [1], [0, 0, 1, 1], [], []>} : vector<8x4xf32>, vector<4x256xf32>, vector<8x256xf32> -> vector<8x256xf32>
    %10 = arith.addf %9, %7 : vector<8x256xf32>
    %c0_11 = arith.constant 0 : index
    %c0_12 = arith.constant 0 : index
    %c0_13 = arith.constant 0 : index
    %11 = vector.load %arg6[%c0_11, %c0_12, %c0_13] : memref<1x8x256xf32, #tpu.memory_space<vmem>>, vector<1x8x256xf32>
    %12 = vector.shape_cast %11 : vector<1x8x256xf32> to vector<8x256xf32>
    %13 = vector.shape_cast %10 : vector<8x256xf32> to vector<1x8x256xf32>
    tpu.vector_store %arg6[%c0_11, %c0_12, %c0_13], %13 {strides = array<i32>} : memref<1x8x256xf32, #tpu.memory_space<vmem>>, vector<1x8x256xf32>,
    return
  }
  func.func @transform_0(%arg0: i32, %arg1: i32) -> (i32, i32, i32) {
    %c0_i32 = arith.constant 0 : i32
    %c0_i32_0 = arith.constant 0 : i32
    return %arg0, %c0_i32, %arg1 : i32, i32, i32
  }
  func.func @transform_1(%arg0: i32, %arg1: i32) -> (i32, i32) {
    %c0_i32 = arith.constant 0 : i32
    %c0_i32_0 = arith.constant 0 : i32
    %c0_i32_1 = arith.constant 0 : i32
    return %c0_i32, %c0_i32_0 : i32, i32
  }
  func.func @transform_2(%arg0: i32, %arg1: i32) -> (i32, i32) {
    %c0_i32 = arith.constant 0 : i32
    %c0_i32_0 = arith.constant 0 : i32
    %c0_i32_1 = arith.constant 0 : i32
    return %c0_i32, %c0_i32_0 : i32, i32
  }
  func.func @transform_3(%arg0: i32, %arg1: i32) -> (i32, i32) {
    %c0_i32 = arith.constant 0 : i32
    %c0_i32_0 = arith.constant 0 : i32
    %c0_i32_1 = arith.constant 0 : i32
    return %c0_i32, %c0_i32_0 : i32, i32
  }
  func.func @transform_4(%arg0: i32, %arg1: i32) -> (i32, i32, i32) {
    %c0_i32 = arith.constant 0 : i32
    %c0_i32_0 = arith.constant 0 : i32
    return %arg0, %c0_i32, %arg1 : i32, i32, i32
  }
}

</mosaic_0001>

<bundles_post_ra>
// kernel: tpu_custom_call.1
= control target key start
LH: loop header
LB: loop body
LE: loop exit
PB: predicated region body
PF: predicated region fallthrough
CT: control target
= control target key end

     0   :  { %9 = vsyncpa [#allocation3], 0  ;;  %s787_s0 = inlined_call_operand.vmem [shape: f32[2,4,256], index: 0, kind: input, shape index: {}]   ;;  %s788_s1 = inlined_call_operand.vmem [shape: f32[8,4], index: 1, kind: input, shape index: {}]   ;;  %s789_s2 = inlined_call_operand.vmem [shape: f32[4,4], index: 2, kind: input, shape index: {}]   ;;  %s790_s3 = inlined_call_operand.vmem [shape: f32[8,4], index: 3, kind: input, shape index: {}]   ;;  %s791_s4 = inlined_call_operand.hbm [shape: f32[2,8,256], index: 4, kind: output, shape index: {}]  }
   0x1   :  { %11 = vsyncpa [#allocation3 + $0x1], 0  ;;  %s669_s15 = smov 0   ;;  %s671_s16 = smov 0  }
   0x2   :  { %s673_s17 = smov 0   ;;  %s675_s18 = smov 0  }
   0x3   :  { %s677_s19 = smov 0   ;;  %s679_s20 = smov 0  }
   0x4 LB: > { %s482_s21 = sadd.s32 4294967295, %s642_s20   ;;  %s483_s22 = sadd.s32 4294967294, %s642_s20   ;;  %s642_s20 = sphi %s679_s20, %s17_s20   ;;  %s638_s19 = sphi %s677_s19, %s798_s19   ;;  %s634_s18 = sphi %s675_s18, %s797_s18   ;;  %s630_s17 = sphi %s673_s17, %s796_s17   ;;  %s626_s16 = sphi %s671_s16, %s795_s16   ;;  %s622_s15 = sphi %s669_s15, %s794_s15  }
   0x5   : > { %s29_s23 = sadd.s32 1, %s638_s19  ;;  %s129_s24 = sadd.s32 1, %s630_s17 }
   0x6   : > { %p31_p0 = scmp.ge.s32.totalorder %s29_s23, 2  ;;  %p139_p1 = scmp.ne.s32.totalorder %s630_s17, %s626_s16 }
   0x7   : > { %p140_p2 = scmp.eq.s32.totalorder %s482_s21, 1  ;;  %p145_p3 = scmp.ne.s32.totalorder %s626_s16, %s622_s15 }
   0x8   : > { %s800_s23 = smov (%p31_p0, %s29_s23), 0  ;;  %p146_p5 = scmp.eq.s32.totalorder %s483_s22, 1 }
   0x9   : > { %p709_p4 = por %p140_p2, %p139_p1  ;;  %s124_s26 = ssub.s32 %s638_s19, %s800_s23 }
   0xa   : > { %p486_p6 = scmp.ge.s32.totalorder %s642_s20, 1  ;;  %p127_p7 = scmp.eq.s32.totalorder %s124_s26, 0 }
   0xb   : > { %p716_p8 = por %p146_p5, %p145_p3  ;;  %p186_p9 = scmp.lt.s32.totalorder %s642_s20, 3 }
   0xc   : > { %s722_s28 = scalar_select %p127_p7, %s630_s17, %s129_s24  }
   0xd   : > { %p187_p10 = pnand %p486_p6, %p186_p9 }
   0xe   : > { %p217_p11 = scmp.lt.s32.totalorder (!%p187_p10), %s634_s18, 1  ;;  %s213_s14 = sand.u32 (!%p187_p10), 1, %s626_s16  }
   0xf   : > { %190 = sbr.rel (%p187_p10) target bundleno = 301 (0x12d), region = 36  ;;  %s487_s21 = sshll.u32 (!%p187_p10), %s213_s14, 4 }
  0x10   : > { %s508_s22 = sshll.u32 (!%p187_p10), %s634_s18, 4  ;;  %s584_s11 = scalar_lea.hbm (!%p187_p10), %s791_s4, 32 }
  0x14   : > { %s218_s29 = scalar_select %p217_p11, %s634_s18, 1  ;;  %vm237_vm0 = vcmask 1043456   ;;  %v228_v1 = vld [vmem:[%s789_s2] sm:$0xf]  ;;  %vm233_vm1 = vcmask 31744  }
  0x15   : > { %v334_v6 = vld [vmem:[%s788_s1] sm:$0xff] }
  0x16   : > { %s507_s30 = sshll.u32 %s218_s29, 3  ;;  %v284_v11 = vld [vmem:[%s790_s3] sm:$0xff]  ;;  %s401_s29 = scalar_lea.hbm %s791_s4, %s508_s22 }
  0x17   : > { %s224_s7 = scalar_lea.vmem %s787_s0, %s507_s30  ;;  %s215_s30 = scalar_lea.vmem [#allocation2], %s487_s21 }
  0x18   : > { %v227_v0 = vld [vmem:[%s224_s7] sm:$0xff]  ;;  %s403_s5 = sshll.u32 %s215_s30, 4  ;;  %s405_s6 = sshll.u32 %s401_s29, 4  ;;  %s404_s5 = int_to_ptr.vmem [resolvable:$true] %s403_s5  ;;  %s406_s6 = int_to_ptr.hbm [resolvable:$true] %s405_s6 }
  0x19   : > { %230 = vst [vmem:[#allocation1] ss:$2 sm:$0xff] %v227_v0  ;;  %s388_s7 = scalar_lea.sflag [#allocation3], %s213_s14  ;;  %s578_s18 = sshra.s32 %s406_s6, 4  ;;  %s579_s18 = int_to_ptr.hbm [resolvable:$true] %s578_s18 }
  0x1a   : > { %s580_s8 = scalar_lea.hbm %s579_s18, 16  ;;  %p585_p1 = scmp.lt.s32.totalorder %s579_s18, %s791_s4 }
  0x1b   : > { %p581_p12 = scmp.ne.s32.totalorder %s579_s18, %s580_s8  ;;  %p586_p2 = scmp.lt.s32.totalorder %s584_s11, %s580_s8 }
  0x1d   : > { %p582_p13 = pnand %p581_p12, %p709_p4  ;;  %p587_p3 = por %p586_p2, %p585_p1 }
  0x1f   : > { %p583_p0 = pneg %p582_p13 }
  0x20   : > { %v231_v2 = vld.sshfl [vmem:[#allocation1] sm:$0xff pattern:$0x75316420]  ;;  %v232_v3 = vld.sshfl [vmem:[#allocation1 + $0x8] sm:$0xff pattern:$0x75316420] }
  0x21   : > { %490 = vmatpush.msk.msra.mxu0 %vm237_vm0, %v231_v2  ;;  %492 = vmatpush.msk.msra.mxu1 %vm237_vm0, %v232_v3  ;;  %335 = vst [vmem:[#allocation1] ss:$2 sm:$0xff] %v227_v0  ;;  %p588_p5 = pnand %p587_p3, %p583_p0 }
  0x22   : > { %491 = vmatmul.msk.f32.vlgmr.msra.gmra.mxu0 %vm233_vm1, %v228_v1  ;;  %493 = vmatmul.msk.f32.vlgmr.msra.gmra.mxu1 %vm233_vm1, %v228_v1 }
  0x28   : > { %v336_v4 = vld.sshfl [vmem:[#allocation1] sm:$0xff pattern:$0x75316420]  ;;  %v337_v5 = vld.sshfl [vmem:[#allocation1 + $0x8] sm:$0xff pattern:$0x75316420] }
  0x29   : > { %498 = vmatpush.msk.msrb.mxu0 %vm237_vm0, %v336_v4  ;;  %500 = vmatpush.msk.msrb.mxu1 %vm237_vm0, %v337_v5 }
  0x2a   : > { %499 = vmatmul.msk.f32.vlgmr.msrb.gmra.mxu0 %vm233_vm1, %v334_v6  ;;  %501 = vmatmul.msk.f32.vlgmr.msrb.gmra.mxu1 %vm233_vm1, %v334_v6 }
  0x9f   : > { %v259_v7 = vpop.f32.mrf.mxu0  ;;  %v279_v8 = vpop.f32.mrf.mxu1 }
  0xa0   : > { %v282_v9 = vmax.f32 %v259_v7, 0.0  ;;  %v283_v10 = vmax.f32 %v279_v8, 0.0 }
  0xa2   : > { %494 = vmatpush.msk.msra.mxu2 %vm237_vm0, %v282_v9  ;;  %496 = vmatpush.msk.msra.mxu3 %vm237_vm0, %v283_v10 }
  0xa3   : > { %495 = vmatmul.msk.f32.vlgmr.msra.gmra.mxu2 %vm233_vm1, %v284_v11  ;;  %497 = vmatmul.msk.f32.vlgmr.msra.gmra.mxu3 %vm233_vm1, %v284_v11 }
  0xa7   : > { %v362_v12 = vpop.f32.mrf.mxu0  ;;  %v382_v13 = vpop.f32.mrf.mxu1 }
 0x126   : > { %v311_v14 = vpop.f32.mrf.mxu2  ;;  %v331_v15 = vpop.f32.mrf.mxu3 }
 0x127   : > { %v363_v16 = vadd.f32 %v362_v12, %v311_v14  ;;  %v383_v17 = vadd.f32 %v382_v13, %v331_v15 }
 0x129   : > { %385 = vst [vmem:[%s215_s30] sm:$0xff] %v363_v16 }
 0x12a   : > { %386 = vst [vmem:[%s215_s30 + $0x8] sm:$0xff] %v383_v17 }
 0x12b   : > { %591 = shalt.err (!%p588_p5)
}
 0x12c   : > { %509 = dma.vmem_to_hbm [thread:$0]  (%p709_p4), %s404_s5, 256, %s406_s6, %s388_s7  }
 0x12d PF: > { %p515_p6 = scmp.ge.s32.totalorder %s642_s20, 2  ;;  %s417_s14 = sand.u32 1, %s622_s15  }
 0x12e   : > { %s418_s21 = scalar_lea.sflag [#allocation3], %s417_s14 }
 0x12f   : > { %p512_p7 = pnand %p515_p6, %p716_p8 }
 0x131   : > { %p513_p9 = pneg %p512_p7 }
 0x133   : > { %617 = dma.done.wait (%p513_p9), %s418_s21, 256  }
 0x134   : > { %619 = vsyncadd (%p513_p9), %s418_s21, 4294967040  ;;  %s17_s20 = sadd.s32 1, %s642_s20   ;;  %s794_s15 = smov %s626_s16 }
 0x135   : > { %p14_p10 = scmp.ge.s32.totalorder %s17_s20, 4   ;;  %s795_s16 = smov %s630_s17 }
 0x136   : > { %s796_s17 = smov %s722_s28  ;;  %s797_s18 = smov %s638_s19 }
 0x137   : > { %s798_s19 = smov %s800_s23  ;;  %16 = sbr.rel (!%p14_p10) target bundleno = 4 (0x4), region = 71 }
 0x13c   :  { %424 = vsyncpa [#allocation3], 1 }
 0x13d   :  { %426 = vsyncpa [#allocation3 + $0x1], 1 }

</bundles_post_ra>
